<compile_context>
chip_gen: v7x
topology: tpu7x:2x2x1
jax: 0.10.0
libtpu: 0.0.40
codegen_flags: <defaults>
</compile_context>

<pallas_src>
import functools

import jax
import jax.numpy as jnp
from jax.experimental import pallas as pl
from jax.experimental.pallas import tpu as pltpu


# ---------------------------------------------------------------------------
# hardware config / helpers
# ---------------------------------------------------------------------------
def _hw_config():
    """(preferred tile, vmem_limit_bytes) per TPU generation."""
    try:
        kind = jax.devices()[0].device_kind.lower()
    except Exception:
        kind = ""
    if "v7" in kind:                       # 64 MiB VMEM/TC, 256-wide MXU
        return 256, 48 * 1024 * 1024
    if "v6" in kind:                       # 128 MiB VMEM, 256-wide MXU
        return 256, 96 * 1024 * 1024
    if "v5 lite" in kind or "v5e" in kind or "v5litepod" in kind:
        return 128, 64 * 1024 * 1024       # 128-wide MXU; VMEM not the constraint
    return 128, 32 * 1024 * 1024           # unknown generation: conservative


def _compiler_params(dims, vmem_limit):
    return pltpu.CompilerParams(dimension_semantics=dims,
                                vmem_limit_bytes=vmem_limit)


@functools.lru_cache(maxsize=1)
def _buffered_one_supported():
    """Probe whether BlockSpec(pipeline_mode=pl.Buffered(1)) lowers & runs."""
    try:
        def k(x_ref, o_ref):
            o_ref[...] = x_ref[...]

        x = jnp.arange(8 * 128, dtype=jnp.float32).reshape(8, 128)
        spec = pl.BlockSpec((8, 128), lambda i: (0, 0),
                            pipeline_mode=pl.Buffered(1))
        out = pl.pallas_call(
            k,
            out_shape=jax.ShapeDtypeStruct((8, 128), jnp.float32),
            grid=(2,),
            in_specs=[spec],
            out_specs=pl.BlockSpec((8, 128), lambda i: (0, 0)),
        )(x)
        out = jax.block_until_ready(out)
        return bool(jnp.all(out == x))
    except Exception:
        return False


def _invariant_spec(shape):
    """Spec for an input whose block never changes across the grid.
    Single-buffered (no pointless double-buffer of resident weights)."""
    index_map = lambda *args: (0,) * len(shape)
    if _buffered_one_supported():
        return pl.BlockSpec(shape, index_map, pipeline_mode=pl.Buffered(1))
    return pl.BlockSpec(shape, index_map)


# ---------------------------------------------------------------------------
# kernel 1: RMSNorm + fused QKV matmul + RoPE (head-major outputs)
# ---------------------------------------------------------------------------
def _make_qkv_rope_kernel(eps, n_heads, n_kv_heads, head_dim):
    half = head_dim // 2
    hd = head_dim

    def kernel(x_ref, anw_ref, wqkv_ref, cosf_ref, sinf_ref, q_ref, k_ref, v_ref):
        x = x_ref[0]                                           # (TS, D) fp32
        ms = jnp.mean(x * x, axis=-1, keepdims=True)
        xn = (x * jax.lax.rsqrt(ms + eps) * anw_ref[...]).astype(jnp.bfloat16)
        qkv = jnp.dot(xn, wqkv_ref[...],
                      preferred_element_type=jnp.float32)      # (TS, NHD+2*KHD)
        cosf = cosf_ref[...]                                   # (TS, hd) = [cos|cos]
        sinf = sinf_ref[...]                                   # (TS, hd) = [-sin|sin]

        def rot(t):   # RoPE in the [evens|odds] layout via an XLU roll
            return t * cosf + pltpu.roll(t, half, axis=1) * sinf

        for h in range(n_heads):
            q_ref[0, h] = rot(qkv[:, h * hd:(h + 1) * hd]).astype(q_ref.dtype)
        koff = n_heads * hd
        voff = koff + n_kv_heads * hd
        for g in range(n_kv_heads):
            k_ref[0, g] = rot(qkv[:, koff + g * hd:koff + (g + 1) * hd]
                              ).astype(k_ref.dtype)
            v_ref[0, g] = qkv[:, voff + g * hd:voff + (g + 1) * hd
                              ].astype(v_ref.dtype)

    return kernel


# ---------------------------------------------------------------------------
# kernel 2: pure flash attention (online softmax), hpg query heads per step
# ---------------------------------------------------------------------------
def _make_attn_kernel(TQ, TK, head_dim, hpg):
    scale = 1.0 / (head_dim ** 0.5)
    NEG = -1e30
    M = hpg * TQ

    def kernel(q_ref, k_ref, v_ref, o_ref, m_scr, l_scr, acc_scr):
        iq = pl.program_id(2)
        ik = pl.program_id(3)
        q_start = iq * TQ
        k_start = ik * TK

        @pl.when(ik == 0)
        def _init():
            m_scr[...] = jnp.full(m_scr.shape, -jnp.inf, m_scr.dtype)
            l_scr[...] = jnp.zeros(l_scr.shape, l_scr.dtype)
            acc_scr[...] = jnp.zeros(acc_scr.shape, acc_scr.dtype)

        # skip compute for KV blocks entirely above the causal diagonal
        # (the clamped index_map below already elides their DMA)
        @pl.when(k_start <= q_start + TQ - 1)
        def _compute():
            q = q_ref[0].reshape(M, head_dim)                  # (hpg*TQ, hd) bf16
            k = k_ref[0, 0]                                    # (TK, hd) bf16
            s = jnp.dot(q, k.T, preferred_element_type=jnp.float32) * scale
            row = q_start + (jax.lax.broadcasted_iota(jnp.int32, (M, TK), 0) % TQ)
            col = k_start + jax.lax.broadcasted_iota(jnp.int32, (M, TK), 1)
            s = jnp.where(row >= col, s, NEG)

            m_prev = m_scr[...]
            m_new = jnp.maximum(m_prev, jnp.max(s, axis=-1, keepdims=True))
            alpha = jnp.exp(m_prev - m_new)
            p = jnp.exp(s - m_new)
            l_scr[...] = alpha * l_scr[...] + jnp.sum(p, axis=-1, keepdims=True)
            acc_scr[...] = alpha * acc_scr[...] + jnp.dot(
                p.astype(jnp.bfloat16), v_ref[0, 0],
                preferred_element_type=jnp.float32)
            m_scr[...] = m_new

        @pl.when(ik == pl.num_programs(3) - 1)
        def _finalize():
            inv_l = pl.reciprocal(l_scr[...], approx=True)
            out = acc_scr[...] * inv_l                         # (hpg*TQ, hd) fp32
            for h in range(hpg):                               # packed (TQ, hpg*hd)
                o_ref[0, :, h * head_dim:(h + 1) * head_dim] = (
                    out[h * TQ:(h + 1) * TQ, :].astype(o_ref.dtype))

    return kernel


# ---------------------------------------------------------------------------
# kernel 3: streamed Wo projection + residual + RMSNorm
# ---------------------------------------------------------------------------
def _make_wo_norm_kernel(eps):
    def kernel(x_ref, o_ref, wo_ref, fnw_ref, h_ref, hn_ref, acc_scr):
        c = pl.program_id(2)

        @pl.when(c == 0)
        def _init():
            acc_scr[...] = jnp.zeros(acc_scr.shape, acc_scr.dtype)

        acc_scr[...] += jnp.dot(o_ref[0], wo_ref[...],
                                preferred_element_type=jnp.float32)

        @pl.when(c == pl.num_programs(2) - 1)
        def _finalize():
            h = x_ref[0] + acc_scr[...]                        # residual, fp32
            h_ref[0] = h.astype(h_ref.dtype)
            ms = jnp.mean(h * h, axis=-1, keepdims=True)
            hn_ref[0] = (h * jax.lax.rsqrt(ms + eps)
                         * fnw_ref[...]).astype(hn_ref.dtype)

    return kernel


# ---------------------------------------------------------------------------
# kernel 4: hidden-chunked SwiGLU FFN (fused w1|w3) + residual
# ---------------------------------------------------------------------------
def _make_ffn_kernel(CH):
    def kernel(h_ref, hn_ref, w13_ref, w2_ref, out_ref, acc_scr):
        c = pl.program_id(2)

        @pl.when(c == 0)
        def _init():
            acc_scr[...] = jnp.zeros(acc_scr.shape, acc_scr.dtype)

        hn = hn_ref[0]                                         # (TS, D) bf16
        x13 = jnp.dot(hn, w13_ref[...], preferred_element_type=jnp.float32)
        x1 = x13[:, :CH]
        x3 = x13[:, CH:]
        gate = (jax.nn.silu(x1) * x3).astype(jnp.bfloat16)
        acc_scr[...] += jnp.dot(gate, w2_ref[...],
                                preferred_element_type=jnp.float32)

        @pl.when(c == pl.num_programs(2) - 1)
        def _finalize():
            out_ref[0] = (h_ref[0] + acc_scr[...]).astype(out_ref.dtype)

    return kernel


# ---------------------------------------------------------------------------
# wrapper
# ---------------------------------------------------------------------------
def transformer_block_forward(x, cos, sin, params, *, n_heads, n_kv_heads,
                              head_dim, eps=1e-5, seq_tile=None, q_tile=None,
                              kv_tile=None, ffn_tile=None, wo_tile=None):
    """params = (wq, wk, wv, wo, w1, w3, w2, attn_norm_w, ffn_norm_w).
    wq / wk columns are pre-permuted per head to [evens | odds] (RoPE 'half'
    layout); wv / wo / w1 / w3 / w2 are unpermuted.  All linear weights are
    (in_features, out_features)."""
    B, S, D = x.shape
    wq, wk, wv, wo, w1, w3, w2, anw, fnw = params
    NHD = n_heads * head_dim
    KHD = n_kv_heads * head_dim
    hidden = w1.shape[1]
    hpg = n_heads // n_kv_heads

    hw_tile, vmem_limit = _hw_config()
    TS = seq_tile or min(S, hw_tile)
    TQ = q_tile or min(S, hw_tile)
    TK = kv_tile or min(S, hw_tile)
    CH = ffn_tile or min(hidden, max(512, 2 * hw_tile))
    CW = wo_tile or min(NHD, 512)
    assert S % TS == 0 and S % TQ == 0 and S % TK == 0
    assert hidden % CH == 0 and NHD % CW == 0
    assert TS % 8 == 0 and TQ % 8 == 0 and TK % 8 == 0
    assert CH % 128 == 0 or CH == hidden
    assert CW % 128 == 0 or CW == NHD
    assert cos.shape[-1] * 2 == head_dim
    # The [evens|odds] RoPE weight-permutation trick requires wq and wk to be
    # permuted identically and wv / wo untouched (score dot is invariant).
    # TODO(synk): head_dim < 128 needs a different per-head lane layout.
    assert head_dim % 128 == 0, "lane-aligned per-head layout needs head_dim % 128 == 0"

    bf16 = jnp.bfloat16
    # fused QKV weight -> one wide MXU call in kernel 1
    wqkv = jnp.concatenate([wq, wk, wv], axis=1).astype(bf16)     # (D, NHD+2*KHD)
    wo_b = wo.astype(bf16)
    # fused, chunk-interleaved w1|w3 so each hidden chunk is one (D, 2*CH) dot
    nC = hidden // CH
    w13 = jnp.concatenate(
        [w1.reshape(D, nC, CH), w3.reshape(D, nC, CH)], axis=2
    ).reshape(D, 2 * hidden).astype(bf16)
    w2_b = w2.astype(bf16)
    # full-lane-width RoPE tables for the roll formulation:
    #   rot(t) = t * [cos|cos] + roll(t, head_dim//2) * [-sin|sin]
    cos_full = jnp.concatenate([cos, cos], axis=-1)               # (S, hd)
    sin_signed = jnp.concatenate([-sin, sin], axis=-1)            # (S, hd)

    # ---- kernel 1: RMSNorm + fused QKV + RoPE (head-major outputs) ---------
    # TODO(synk): at very large D*NHD on v7x (64 MiB VMEM), stream wqkv columns
    # over an extra grid axis instead of keeping the fused weight resident.
    q_hm, k_hm, v_hm = pl.pallas_call(
        _make_qkv_rope_kernel(eps, n_heads, n_kv_heads, head_dim),
        out_shape=(jax.ShapeDtypeStruct((B, n_heads, S, head_dim), bf16),
                   jax.ShapeDtypeStruct((B, n_kv_heads, S, head_dim), bf16),
                   jax.ShapeDtypeStruct((B, n_kv_heads, S, head_dim), bf16)),
        grid=(B, S // TS),
        in_specs=[
            pl.BlockSpec((1, TS, D), lambda b, s: (b, s, 0)),
            _invariant_spec((1, D)),
            _invariant_spec((D, NHD + 2 * KHD)),
            pl.BlockSpec((TS, head_dim), lambda b, s: (s, 0)),
            pl.BlockSpec((TS, head_dim), lambda b, s: (s, 0)),
        ],
        out_specs=(
            pl.BlockSpec((1, n_heads, TS, head_dim), lambda b, s: (b, 0, s, 0)),
            pl.BlockSpec((1, n_kv_heads, TS, head_dim), lambda b, s: (b, 0, s, 0)),
            pl.BlockSpec((1, n_kv_heads, TS, head_dim), lambda b, s: (b, 0, s, 0)),
        ),
        compiler_params=_compiler_params(("parallel", "parallel"), vmem_limit),
    )(x, anw, wqkv, cos_full, sin_signed)

    # ---- kernel 2: flash attention, grouped over kv-heads (GQA reuse) ------
    nQ, nK = S // TQ, S // TK

    def kv_map(b, g, iq, ik):
        # clamp: fully-masked KV blocks re-use the previous block => DMA elided
        return (b, g, jnp.minimum(ik, (iq * TQ + TQ - 1) // TK), 0)

    attn = pl.pallas_call(
        _make_attn_kernel(TQ, TK, head_dim, hpg),
        out_shape=jax.ShapeDtypeStruct((B, S, NHD), bf16),
        grid=(B, n_kv_heads, nQ, nK),
        in_specs=[
            pl.BlockSpec((1, hpg, TQ, head_dim),
                         lambda b, g, iq, ik: (b, g, iq, 0)),
            pl.BlockSpec((1, 1, TK, head_dim), kv_map),
            pl.BlockSpec((1, 1, TK, head_dim), kv_map),
        ],
        out_specs=pl.BlockSpec((1, TQ, hpg * head_dim),
                               lambda b, g, iq, ik: (b, iq, g)),
        scratch_shapes=[
            pltpu.VMEM((hpg * TQ, 1), jnp.float32),        # running max
            pltpu.VMEM((hpg * TQ, 1), jnp.float32),        # running denom
            pltpu.VMEM((hpg * TQ, head_dim), jnp.float32),  # output accumulator
        ],
        # TODO(synk): on v7x consider CORE_PARALLEL on the batch/kv-head axis
        # if B * n_kv_heads * nQ is too small to feed both TensorCores.
        compiler_params=_compiler_params(
            ("parallel", "parallel", "parallel", "arbitrary"), vmem_limit),
    )(q_hm, k_hm, v_hm)

    # ---- kernel 3: streamed Wo projection + residual + RMSNorm -------------
    h, hn = pl.pallas_call(
        _make_wo_norm_kernel(eps),
        out_shape=(jax.ShapeDtypeStruct((B, S, D), jnp.float32),
                   jax.ShapeDtypeStruct((B, S, D), bf16)),
        grid=(B, S // TS, NHD // CW),
        in_specs=[
            pl.BlockSpec((1, TS, D), lambda b, s, c: (b, s, 0)),
            pl.BlockSpec((1, TS, CW), lambda b, s, c: (b, s, c)),
            pl.BlockSpec((CW, D), lambda b, s, c: (c, 0)),
            _invariant_spec((1, D)),
        ],
        out_specs=(
            pl.BlockSpec((1, TS, D), lambda b, s, c: (b, s, 0)),
            pl.BlockSpec((1, TS, D), lambda b, s, c: (b, s, 0)),
        ),
        scratch_shapes=[pltpu.VMEM((TS, D), jnp.float32)],
        compiler_params=_compiler_params(("parallel", "parallel", "arbitrary"),
                                         vmem_limit),
    )(x, attn, wo_b, fnw)

    # ---- kernel 4: hidden-chunked SwiGLU FFN + residual ---------------------
    out = pl.pallas_call(
        _make_ffn_kernel(CH),
        out_shape=jax.ShapeDtypeStruct((B, S, D), x.dtype),
        grid=(B, S // TS, nC),
        in_specs=[
            pl.BlockSpec((1, TS, D), lambda b, s, c: (b, s, 0)),
            pl.BlockSpec((1, TS, D), lambda b, s, c: (b, s, 0)),
            pl.BlockSpec((D, 2 * CH), lambda b, s, c: (0, c)),
            pl.BlockSpec((CH, D), lambda b, s, c: (c, 0)),
        ],
        out_specs=pl.BlockSpec((1, TS, D), lambda b, s, c: (b, s, 0)),
        scratch_shapes=[pltpu.VMEM((TS, D), jnp.float32)],
        compiler_params=_compiler_params(("parallel", "parallel", "arbitrary"),
                                         vmem_limit),
    )(h, hn, w13, w2_b)

    return out


def precompute_rope(seq_len, head_dim, theta):
    half = head_dim // 2
    inv_freq = 1.0 / (theta ** (jnp.arange(half, dtype=jnp.float32) * 2.0 / head_dim))
    t = jnp.arange(seq_len, dtype=jnp.float32)
    ang = jnp.outer(t, inv_freq)                                  # (S, half)
    return jnp.cos(ang), jnp.sin(ang)


# ------------------ pure-JAX reference (torch semantics) --------------------
def reference_block(x, cos, sin, wq_t, wk_t, wv_t, wo_t, w1_t, w3_t, w2_t,
                    anw, fnw, *, n_heads, n_kv_heads, head_dim, eps=1e-5):
    B, S, D = x.shape

    def rmsnorm(v, w):
        ms = jnp.mean(v * v, axis=-1, keepdims=True)
        return v * jax.lax.rsqrt(ms + eps) * w

    xn = rmsnorm(x, anw)
    xq = (xn @ wq_t).reshape(B, S, n_heads, head_dim)
    xk = (xn @ wk_t).reshape(B, S, n_kv_heads, head_dim)
    xv = (xn @ wv_t).reshape(B, S, n_kv_heads, head_dim)

    def rope(t):                                  # interleaved pairs, like torch
        nH = t.shape[2]
        tr = t.reshape(B, S, nH, head_dim // 2, 2)
        t0, t1 = tr[..., 0], tr[..., 1]
        c = cos[None, :, None, :]
        s = sin[None, :, None, :]
        o0 = t0 * c - t1 * s
        o1 = t0 * s + t1 * c
        return jnp.stack([o0, o1], axis=-1).reshape(B, S, nH, head_dim)

    xq, xk = rope(xq), rope(xk)
    hpg = n_heads // n_kv_heads
    xk = jnp.repeat(xk, hpg, axis=2)
    xv = jnp.repeat(xv, hpg, axis=2)

    scale = 1.0 / (head_dim ** 0.5)
    scores = jnp.einsum('bqhd,bkhd->bhqk', xq, xk) * scale
    causal = jnp.tril(jnp.ones((S, S), bool))
    scores = jnp.where(causal[None, None], scores, -jnp.inf)
    attn = jax.nn.softmax(scores, axis=-1)
    out = jnp.einsum('bhqk,bkhd->bqhd', attn, xv).reshape(B, S, n_heads * head_dim)
    h = x + out @ wo_t
    hn = rmsnorm(h, fnw)
    return h + (jax.nn.silu(hn @ w1_t) * (hn @ w3_t)) @ w2_t


if __name__ == "__main__":
    # BaseTransformerArgs-style config, small but lane-aligned:
    # dim=256, n_heads=2 (head_dim=128), n_kv_heads=1 (GQA), seq=16, batch=2.
    B, S = 2, 16
    dim, n_heads, n_kv_heads = 256, 2, 1
    head_dim = dim // n_heads                    # 128
    multiple_of, rope_theta, eps = 256, 10000.0, 1e-5
    hidden = int(2 * (4 * dim) / 3)
    hidden = multiple_of * ((hidden + multiple_of - 1) // multiple_of)   # 768

    key = jax.random.PRNGKey(0)
    ks = jax.random.split(key, 8)
    std_in, std_out = dim ** -0.5, hidden ** -0.5
    # weights stored transposed: (in_features, out_features)
    wq_t = jax.random.normal(ks[0], (dim, n_heads * head_dim), jnp.float32) * std_in
    wk_t = jax.random.normal(ks[1], (dim, n_kv_heads * head_dim), jnp.float32) * std_in
    wv_t = jax.random.normal(ks[2], (dim, n_kv_heads * head_dim), jnp.float32) * std_in
    wo_t = jax.random.normal(ks[3], (n_heads * head_dim, dim), jnp.float32) * std_in
    w1_t = jax.random.normal(ks[4], (dim, hidden), jnp.float32) * std_in
    w3_t = jax.random.normal(ks[5], (dim, hidden), jnp.float32) * std_in
    w2_t = jax.random.normal(ks[6], (hidden, dim), jnp.float32) * std_out
    anw = jnp.ones((1, dim), jnp.float32)        # RMSNorm weights init to 1
    fnw = jnp.ones((1, dim), jnp.float32)

    x = jax.random.normal(ks[7], (B, S, dim), jnp.float32)
    cos, sin = precompute_rope(S, head_dim, rope_theta)

    # permute Wq / Wk output columns per head: interleaved (2i, 2i+1) -> [evens | odds]
    half = head_dim // 2
    def rope_perm(num_heads):
        idx = []
        for h in range(num_heads):
            base = h * head_dim
            idx += [base + 2 * i for i in range(half)]
            idx += [base + 2 * i + 1 for i in range(half)]
        return jnp.array(idx, jnp.int32)

    wq_k = wq_t[:, rope_perm(n_heads)]
    wk_k = wk_t[:, rope_perm(n_kv_heads)]

    out = transformer_block_forward(
        x, cos, sin,
        (wq_k, wk_k, wv_t, wo_t, w1_t, w3_t, w2_t, anw, fnw),
        n_heads=n_heads, n_kv_heads=n_kv_heads, head_dim=head_dim, eps=eps,
        seq_tile=8, q_tile=8, kv_tile=8, ffn_tile=256)
    out = jax.block_until_ready(out)

    ref = reference_block(
        x, cos, sin, wq_t, wk_t, wv_t, wo_t, w1_t, w3_t, w2_t, anw, fnw,
        n_heads=n_heads, n_kv_heads=n_kv_heads, head_dim=head_dim, eps=eps)

    assert out.shape == (B, S, dim)
    err = float(jnp.max(jnp.abs(out.astype(jnp.float32) - ref)))
    # bf16 matmul operands + approx reciprocal vs fp32 reference -> relaxed tolerance
    assert jnp.allclose(out, ref, atol=5e-2, rtol=5e-2), f"max abs err {err}"
    print("KERNEL_OK")
</pallas_src>

<mosaic_0001>
module attributes {stable_mosaic.version = 11 : i64} {
  func.func @k(%arg0: i32, %arg1: memref<8x128xf32, #tpu.memory_space<vmem>>, %arg2: memref<8x128xf32, #tpu.memory_space<vmem>>) attributes {dimension_semantics = [#tpu.dimension_semantics<arbitrary>], iteration_bounds = array<i64: 2>, scalar_prefetch = 0 : i64, scratch_operands = 0 : i64, tpu.core_type = #tpu.core_type<tc>, window_params = [{pipeline_mode = #tpu.pipeline_mode<synchronous>, transform_indices = @transform_0, window_bounds = array<i64: 8, 128>}, {pipeline_mode = #tpu.pipeline_mode<synchronous>, transform_indices = @transform_1, window_bounds = array<i64: 8, 128>}]} {
    %c0 = arith.constant 0 : index
    %c0_0 = arith.constant 0 : index
    %0 = vector.load %arg1[%c0, %c0_0] : memref<8x128xf32, #tpu.memory_space<vmem>>, vector<8x128xf32>
    %c0_1 = arith.constant 0 : index
    %c0_2 = arith.constant 0 : index
    %1 = vector.load %arg2[%c0_1, %c0_2] : memref<8x128xf32, #tpu.memory_space<vmem>>, vector<8x128xf32>
    tpu.vector_store %arg2[%c0_1, %c0_2], %0 {strides = array<i32>} : memref<8x128xf32, #tpu.memory_space<vmem>>, vector<8x128xf32>,
    return
  }
  func.func @transform_0(%arg0: i32) -> (i32, i32) {
    %c0_i32 = arith.constant 0 : i32
    %c0_i32_0 = arith.constant 0 : i32
    %c0_i32_1 = arith.constant 0 : i32
    return %c0_i32, %c0_i32_0 : i32, i32
  }
  func.func @transform_1(%arg0: i32) -> (i32, i32) {
    %c0_i32 = arith.constant 0 : i32
    %c0_i32_0 = arith.constant 0 : i32
    %c0_i32_1 = arith.constant 0 : i32
    return %c0_i32, %c0_i32_0 : i32, i32
  }
}

module attributes {stable_mosaic.version = 11 : i64} {
  func.func @kernel(%arg0: i32, %arg1: i32, %arg2: memref<1x8x256xf32, #tpu.memory_space<vmem>>, %arg3: memref<1x256xf32, #tpu.memory_space<vmem>>, %arg4: memref<256x512xbf16, #tpu.memory_space<vmem>>, %arg5: memref<8x128xf32, #tpu.memory_space<vmem>>, %arg6: memref<8x128xf32, #tpu.memory_space<vmem>>, %arg7: memref<1x2x8x128xbf16, #tpu.memory_space<vmem>>, %arg8: memref<1x1x8x128xbf16, #tpu.memory_space<vmem>>, %arg9: memref<1x1x8x128xbf16, #tpu.memory_space<vmem>>) attributes {dimension_semantics = [#tpu.dimension_semantics<parallel>, #tpu.dimension_semantics<parallel>], iteration_bounds = array<i64: 2, 2>, scalar_prefetch = 0 : i64, scratch_operands = 0 : i64, tpu.core_type = #tpu.core_type<tc>, window_params = [{transform_indices = @transform_0, window_bounds = array<i64: 1, 8, 256>}, {pipeline_mode = #tpu.pipeline_mode<synchronous>, transform_indices = @transform_1, window_bounds = array<i64: 1, 256>}, {pipeline_mode = #tpu.pipeline_mode<synchronous>, transform_indices = @transform_2, window_bounds = array<i64: 256, 512>}, {transform_indices = @transform_3, window_bounds = array<i64: 8, 128>}, {transform_indices = @transform_4, window_bounds = array<i64: 8, 128>}, {transform_indices = @transform_5, window_bounds = array<i64: 1, 2, 8, 128>}, {transform_indices = @transform_6, window_bounds = array<i64: 1, 1, 8, 128>}, {transform_indices = @transform_7, window_bounds = array<i64: 1, 1, 8, 128>}]} {
    %c0 = arith.constant 0 : index
    %c0_0 = arith.constant 0 : index
    %c0_1 = arith.constant 0 : index
    %0 = vector.load %arg2[%c0, %c0_0, %c0_1] : memref<1x8x256xf32, #tpu.memory_space<vmem>>, vector<1x8x256xf32>
    %1 = vector.shape_cast %0 : vector<1x8x256xf32> to vector<8x256xf32>
    %2 = arith.mulf %1, %1 : vector<8x256xf32>
    %cst = arith.constant dense<0.000000e+00> : vector<8xf32>
    %3 = vector.multi_reduction <add>, %2, %cst [1] : vector<8x256xf32> to vector<8xf32>
    %4 = vector.shape_cast %3 : vector<8xf32> to vector<8x1xf32>
    %cst_2 = arith.constant 2.560000e+02 : f32
    %5 = vector.broadcast %cst_2 : f32 to vector<8x1xf32>
    %6 = arith.divf %4, %5 : vector<8x1xf32>
    %cst_3 = arith.constant 9.99999974E-6 : f32
    %7 = vector.broadcast %cst_3 : f32 to vector<8x1xf32>
    %8 = arith.addf %6, %7 : vector<8x1xf32>
    %9 = math.rsqrt %8 : vector<8x1xf32>
    %10 = vector.broadcast %9 : vector<8x1xf32> to vector<8x256xf32>
    %11 = arith.mulf %1, %10 : vector<8x256xf32>
    %c0_4 = arith.constant 0 : index
    %c0_5 = arith.constant 0 : index
    %12 = vector.load %arg3[%c0_4, %c0_5] : memref<1x256xf32, #tpu.memory_space<vmem>>, vector<1x256xf32>
    %13 = vector.broadcast %12 : vector<1x256xf32> to vector<8x256xf32>
    %14 = arith.mulf %11, %13 : vector<8x256xf32>
    %15 = arith.truncf %14 : vector<8x256xf32> to vector<8x256xbf16>
    %c0_6 = arith.constant 0 : index
    %c0_7 = arith.constant 0 : index
    %16 = vector.load %arg4[%c0_6, %c0_7] : memref<256x512xbf16, #tpu.memory_space<vmem>>, vector<256x512xbf16>
    %cst_8 = arith.constant dense<0.000000e+00> : vector<8x512xf32>
    %17 = tpu.matmul %15, %16, %cst_8 {dimension_numbers = #tpu.dot_dimension_numbers<[1], [0], [0], [1], [0, 0, 1, 1], [], []>} : vector<8x256xbf16>, vector<256x512xbf16>, vector<8x512xf32> -> vector<8x512xf32>
    %c0_9 = arith.constant 0 : index
    %c0_10 = arith.constant 0 : index
    %18 = vector.load %arg5[%c0_9, %c0_10] : memref<8x128xf32, #tpu.memory_space<vmem>>, vector<8x128xf32>
    %c0_11 = arith.constant 0 : index
    %c0_12 = arith.constant 0 : index
    %19 = vector.load %arg6[%c0_11, %c0_12] : memref<8x128xf32, #tpu.memory_space<vmem>>, vector<8x128xf32>
    %20 = vector.extract_strided_slice %17 {offsets = [0, 0], sizes = [8, 128], strides = [1, 1]} : vector<8x512xf32> to vector<8x128xf32>
    %21 = arith.mulf %20, %18 : vector<8x128xf32>
    %c64_i32 = arith.constant 64 : i32
    %22 = tpu.dynamic_rotate %20 by %c64_i32 dim 1 : vector<8x128xf32>, i32 -> vector<8x128xf32>
    %23 = arith.mulf %22, %19 : vector<8x128xf32>
    %24 = arith.addf %21, %23 : vector<8x128xf32>
    %25 = arith.truncf %24 : vector<8x128xf32> to vector<8x128xbf16>
    %c0_13 = arith.constant 0 : index
    %c0_14 = arith.constant 0 : index
    %c0_15 = arith.constant 0 : index
    %c0_16 = arith.constant 0 : index
    %26 = vector.load %arg7[%c0_13, %c0_14, %c0_15, %c0_16] : memref<1x2x8x128xbf16, #tpu.memory_space<vmem>>, vector<1x1x8x128xbf16>
    %27 = vector.shape_cast %26 : vector<1x1x8x128xbf16> to vector<8x128xbf16>
    %28 = vector.shape_cast %25 : vector<8x128xbf16> to vector<1x1x8x128xbf16>
    tpu.vector_store %arg7[%c0_13, %c0_14, %c0_15, %c0_16], %28 {strides = array<i32>} : memref<1x2x8x128xbf16, #tpu.memory_space<vmem>>, vector<1x1x8x128xbf16>,
    %29 = vector.extract_strided_slice %17 {offsets = [0, 128], sizes = [8, 128], strides = [1, 1]} : vector<8x512xf32> to vector<8x128xf32>
    %30 = arith.mulf %29, %18 : vector<8x128xf32>
    %c64_i32_17 = arith.constant 64 : i32
    %31 = tpu.dynamic_rotate %29 by %c64_i32_17 dim 1 : vector<8x128xf32>, i32 -> vector<8x128xf32>
    %32 = arith.mulf %31, %19 : vector<8x128xf32>
    %33 = arith.addf %30, %32 : vector<8x128xf32>
    %34 = arith.truncf %33 : vector<8x128xf32> to vector<8x128xbf16>
    %c0_18 = arith.constant 0 : index
    %c1 = arith.constant 1 : index
    %c0_19 = arith.constant 0 : index
    %c0_20 = arith.constant 0 : index
    %35 = vector.load %arg7[%c0_18, %c1, %c0_19, %c0_20] : memref<1x2x8x128xbf16, #tpu.memory_space<vmem>>, vector<1x1x8x128xbf16>
    %36 = vector.shape_cast %35 : vector<1x1x8x128xbf16> to vector<8x128xbf16>
    %37 = vector.shape_cast %34 : vector<8x128xbf16> to vector<1x1x8x128xbf16>
    tpu.vector_store %arg7[%c0_18, %c1, %c0_19, %c0_20], %37 {strides = array<i32>} : memref<1x2x8x128xbf16, #tpu.memory_space<vmem>>, vector<1x1x8x128xbf16>,
    %38 = vector.extract_strided_slice %17 {offsets = [0, 256], sizes = [8, 128], strides = [1, 1]} : vector<8x512xf32> to vector<8x128xf32>
    %39 = arith.mulf %38, %18 : vector<8x128xf32>
    %c64_i32_21 = arith.constant 64 : i32
    %40 = tpu.dynamic_rotate %38 by %c64_i32_21 dim 1 : vector<8x128xf32>, i32 -> vector<8x128xf32>
    %41 = arith.mulf %40, %19 : vector<8x128xf32>
    %42 = arith.addf %39, %41 : vector<8x128xf32>
    %43 = arith.truncf %42 : vector<8x128xf32> to vector<8x128xbf16>
    %c0_22 = arith.constant 0 : index
    %c0_23 = arith.constant 0 : index
    %c0_24 = arith.constant 0 : index
    %c0_25 = arith.constant 0 : index
    %44 = vector.load %arg8[%c0_22, %c0_23, %c0_24, %c0_25] : memref<1x1x8x128xbf16, #tpu.memory_space<vmem>>, vector<1x1x8x128xbf16>
    %45 = vector.shape_cast %44 : vector<1x1x8x128xbf16> to vector<8x128xbf16>
    %46 = vector.shape_cast %43 : vector<8x128xbf16> to vector<1x1x8x128xbf16>
    tpu.vector_store %arg8[%c0_22, %c0_23, %c0_24, %c0_25], %46 {strides = array<i32>} : memref<1x1x8x128xbf16, #tpu.memory_space<vmem>>, vector<1x1x8x128xbf16>,
    %47 = vector.extract_strided_slice %17 {offsets = [0, 384], sizes = [8, 128], strides = [1, 1]} : vector<8x512xf32> to vector<8x128xf32>
    %48 = arith.truncf %47 : vector<8x128xf32> to vector<8x128xbf16>
    %c0_26 = arith.constant 0 : index
    %c0_27 = arith.constant 0 : index
    %c0_28 = arith.constant 0 : index
    %c0_29 = arith.constant 0 : index
    %49 = vector.load %arg9[%c0_26, %c0_27, %c0_28, %c0_29] : memref<1x1x8x128xbf16, #tpu.memory_space<vmem>>, vector<1x1x8x128xbf16>
    %50 = vector.shape_cast %49 : vector<1x1x8x128xbf16> to vector<8x128xbf16>
    %51 = vector.shape_cast %48 : vector<8x128xbf16> to vector<1x1x8x128xbf16>
    tpu.vector_store %arg9[%c0_26, %c0_27, %c0_28, %c0_29], %51 {strides = array<i32>} : memref<1x1x8x128xbf16, #tpu.memory_space<vmem>>, vector<1x1x8x128xbf16>,
    return
  }
  func.func @transform_0(%arg0: i32, %arg1: i32) -> (i32, i32, i32) {
    %c0_i32 = arith.constant 0 : i32
    %c0_i32_0 = arith.constant 0 : i32
    return %arg0, %arg1, %c0_i32 : i32, i32, i32
  }
  func.func @transform_1(%arg0: i32, %arg1: i32) -> (i32, i32) {
    %c0_i32 = arith.constant 0 : i32
    %c0_i32_0 = arith.constant 0 : i32
    %c0_i32_1 = arith.constant 0 : i32
    return %c0_i32, %c0_i32_0 : i32, i32
  }
  func.func @transform_2(%arg0: i32, %arg1: i32) -> (i32, i32) {
    %c0_i32 = arith.constant 0 : i32
    %c0_i32_0 = arith.constant 0 : i32
    %c0_i32_1 = arith.constant 0 : i32
    return %c0_i32, %c0_i32_0 : i32, i32
  }
  func.func @transform_3(%arg0: i32, %arg1: i32) -> (i32, i32) {
    %c0_i32 = arith.constant 0 : i32
    %c0_i32_0 = arith.constant 0 : i32
    return %arg1, %c0_i32 : i32, i32
  }
  func.func @transform_4(%arg0: i32, %arg1: i32) -> (i32, i32) {
    %c0_i32 = arith.constant 0 : i32
    %c0_i32_0 = arith.constant 0 : i32
    return %arg1, %c0_i32 : i32, i32
  }
  func.func @transform_5(%arg0: i32, %arg1: i32) -> (i32, i32, i32, i32) {
    %c0_i32 = arith.constant 0 : i32
    %c0_i32_0 = arith.constant 0 : i32
    %c0_i32_1 = arith.constant 0 : i32
    return %arg0, %c0_i32, %arg1, %c0_i32_0 : i32, i32, i32, i32
  }
  func.func @transform_6(%arg0: i32, %arg1: i32) -> (i32, i32, i32, i32) {
    %c0_i32 = arith.constant 0 : i32
    %c0_i32_0 = arith.constant 0 : i32
    %c0_i32_1 = arith.constant 0 : i32
    return %arg0, %c0_i32, %arg1, %c0_i32_0 : i32, i32, i32, i32
  }
  func.func @transform_7(%arg0: i32, %arg1: i32) -> (i32, i32, i32, i32) {
    %c0_i32 = arith.constant 0 : i32
    %c0_i32_0 = arith.constant 0 : i32
    %c0_i32_1 = arith.constant 0 : i32
    return %arg0, %c0_i32, %arg1, %c0_i32_0 : i32, i32, i32, i32
  }
}

</mosaic_0001>

<bundles_post_ra>
// kernel: tpu_custom_call.1
= control target key start
LH: loop header
LB: loop body
LE: loop exit
PB: predicated region body
PF: predicated region fallthrough
CT: control target
= control target key end

     0   :  { %6 = vsyncpa [#allocation3], 0  ;;  %s340_s0 = inlined_call_operand.hbm [shape: f32[8,128], index: 0, kind: input, shape index: {}]   ;;  %s341_s1 = inlined_call_operand.hbm [shape: f32[8,128], index: 1, kind: output, shape index: {}]  }
   0x1   :  { %7 = vsyncpa [#allocation4], 0  ;;  %s261_s6 = smov 0  }
   0x2 LB: > { %s144_s7 = sadd.s32 4294967295, %s247_s6   ;;  %p145_p0 = scmp.ge.s32.totalorder %s247_s6, 1  ;;  %s247_s6 = sphi %s261_s6, %s13_s6  }
   0x3   : > { %p60_p1 = scmp.lt.s32.totalorder %s247_s6, 3  ;;  %p275_p3 = scmp.eq.s32.totalorder %s144_s7, 0 }
   0x4   : > { %s249_s10 = smov [#allocation2]   ;;  %s179_s15 = scalar_lea.hbm %s340_s0, 128 }
   0x5   : > { %p269_p2 = pnand %p145_p0, %p60_p1  ;;  %s73_s11 = sshll.u32 %s249_s10, 4  ;;  %s74_s11 = int_to_ptr.vmem [resolvable:$true] %s73_s11 }
   0x6   : > { %s346_s9 = scalar_select %p275_p3, 1, 0 }
   0x7   : > { %s345_s8 = scalar_select %p269_p2, 1, 0 }
   0x8   : > { %p161_p4 = pneg %p269_p2  ;;  %p180_p6 = scmp.ne.s32.totalorder %s340_s0, %s179_s15 }
   0x9   : > { %p186_p10 = scmp.lt.u32.totalorder %s179_s15, %s340_s0 }
   0xa   : > { %p283_p5 = pnand %p275_p3, %p161_p4 }
   0xc   : > { %p181_p7 = pneg %p283_p5 }
   0xe   : > { %p182_p8 = pnand %p181_p7, %p180_p6 }
  0x10   : > { %p183_p9 = pneg %p182_p8 }
  0x12   : > { %p188_p11 = pnand %p186_p10, %p183_p9 }
  0x14   : > { %191 = shalt.err (!%p188_p11)
}
  0x15   : > { %s192_s20 = scalar_lea.vmem %s74_s11, 128  ;;  %p200_p1 = scmp.lt.s32.totalorder %s74_s11, %s74_s11 }
  0x16   : > { %p193_p12 = scmp.ne.s32.totalorder %s74_s11, %s192_s20  ;;  %p201_p4 = scmp.lt.s32.totalorder %s192_s20, %s192_s20 }
  0x18   : > { %p195_p13 = pnand %p193_p12, %p181_p7  ;;  %p202_p3 = por %p201_p4, %p200_p1 }
  0x1a   : > { %p196_p0 = pneg %p195_p13 }
  0x1c   : > { %p203_p2 = pnand %p202_p3, %p196_p0 }
  0x1e   : > { %206 = shalt.err (!%p203_p2)
}
  0x1f   : > { %164 = dma.hbm_to_vmem [thread:$0]  (!%p283_p5), %s340_s0, 128, %s74_s11, [#allocation3]  }
  0x20   : > { %p348_p6 = scmp.ne.s32.totalorder %s345_s8, 0 }
  0x21   : > { %p349_p8 = scmp.ne.s32.totalorder (!%p348_p6), %s346_s9, 0 }
  0x22   : > { %86 = sbr.rel (%p348_p6) target bundleno = 67 (0x43), region = 24 }
  0x29   : > { %238 = dma.done.wait (%p349_p8), [#allocation3], 128  }
  0x2a   : > { %240 = vsyncadd (%p349_p8), [#allocation3], 4294967168  ;;  %s250_s23 = smov [#allocation5]   ;;  %p311_p2 = scmp.eq.s32.totalorder %s144_s7, 1  ;;  %v96_v0 = vld [vmem:[#allocation2] sm:$0xff] }
  0x2b   : > { %s105_s24 = sshll.u32 %s250_s23, 4  ;;  %97 = vst [vmem:[#allocation5] sm:$0xff] %v96_v0  ;;  %s106_s24 = int_to_ptr.vmem [resolvable:$true] %s105_s24 }
  0x2c   : > { %s207_s26 = scalar_lea.vmem %s106_s24, 128  ;;  %p214_p9 = scmp.lt.s32.totalorder %s106_s24, %s106_s24 }
  0x2d   : > { %p208_p3 = scmp.ne.s32.totalorder %s106_s24, %s207_s26  ;;  %p215_p10 = scmp.lt.s32.totalorder %s207_s26, %s207_s26 }
  0x2f   : > { %p209_p5 = pnand %p208_p3, %p311_p2  ;;  %p216_p11 = por %p215_p10, %p214_p9 }
  0x31   : > { %p210_p7 = pneg %p209_p5 }
  0x33   : > { %p217_p12 = pnand %p216_p11, %p210_p7 }
  0x35   : > { %220 = shalt.err (!%p217_p12)
}
  0x36   : > { %s221_s29 = scalar_lea.hbm %s341_s1, 128 }
  0x37   : > { %p222_p13 = scmp.ne.s32.totalorder %s341_s1, %s221_s29  ;;  %p227_p4 = scmp.lt.u32.totalorder %s221_s29, %s341_s1 }
  0x39   : > { %p223_p0 = pnand %p222_p13, %p311_p2 }
  0x3b   : > { %p224_p1 = pneg %p223_p0 }
  0x3d   : > { %p229_p6 = pnand %p227_p4, %p224_p1 }
  0x3f   : > { %232 = shalt.err (!%p229_p6)
}
  0x40   : > { %158 = dma.vmem_to_hbm [thread:$0]  (%p311_p2), %s106_s24, 128, %s341_s1, [#allocation4]  }
  0x41   : > { %242 = dma.done.wait (%p311_p2), [#allocation4], 128  }
  0x42   : > { %244 = vsyncadd (%p311_p2), [#allocation4], 4294967168 }
  0x43 PF: > { %s13_s6 = sadd.s32 1, %s247_s6  }
  0x44   : > { %p10_p8 = scmp.ge.s32.totalorder %s13_s6, 4  }
  0x46   :  { %12 = sbr.rel (!%p10_p8) target bundleno = 2 (0x2), region = 53 }
  0x4d   :  { %118 = vsyncpa [#allocation3], 1 }
  0x4e   :  { %120 = vsyncpa [#allocation3 + $0x1], 1 }
  0x4f   :  { %121 = vsyncpa [#allocation4], 1 }
  0x50   :  { %123 = vsyncpa [#allocation4 + $0x1], 1 }

// kernel: tpu_custom_call.1
= control target key start
LH: loop header
LB: loop body
LE: loop exit
PB: predicated region body
PF: predicated region fallthrough
CT: control target
= control target key end

     0   :  { %s2391_s0 = inlined_call_operand.hbm [shape: f32[2,16,256], index: 0, kind: input, shape index: {}]   ;;  %s2392_s1 = inlined_call_operand.vmem [shape: f32[1,256], index: 1, kind: input, shape index: {}]   ;;  %s2393_s2 = inlined_call_operand.hbm [shape: bf16[256,512], index: 2, kind: input, shape index: {}]   ;;  %s2394_s3 = inlined_call_operand.hbm [shape: f32[16,128], index: 3, kind: input, shape index: {}]   ;;  %s2395_s4 = inlined_call_operand.hbm [shape: f32[16,128], index: 4, kind: input, shape index: {}]   ;;  %s2396_s5 = inlined_call_operand.hbm [shape: bf16[2,2,16,128], index: 5, kind: output, shape index: {0}]   ;;  %s2397_s6 = inlined_call_operand.hbm [shape: bf16[2,1,16,128], index: 6, kind: output, shape index: {1}]   ;;  %s2398_s7 = inlined_call_operand.hbm [shape: bf16[2,1,16,128], index: 7, kind: output, shape index: {2}]  }
   0x1   :  { %2421 = sst [smem:[#allocation26_spill]] %s2391_s0 }
   0x2   :  { %2422 = sst [smem:[#allocation27_spill]] %s2392_s1 }
   0x3   :  { %2423 = sst [smem:[#allocation28_spill]] %s2393_s2 }
   0x4   :  { %2424 = sst [smem:[#allocation29_spill]] %s2394_s3 }
   0x5   :  { %2425 = sst [smem:[#allocation30_spill]] %s2396_s5 }
   0x6   :  { %2426 = sst [smem:[#allocation31_spill]] %s2397_s6 }
   0x7   :  { %2427 = sst [smem:[#allocation32_spill]] %s2398_s7 }
   0x8   :  { %13 = vsyncpa [#allocation3], 0 }
   0x9   :  { %15 = vsyncpa [#allocation3 + $0x1], 0 }
   0xa   :  { %16 = vsyncpa [#allocation6], 0 }
   0xb   :  { %17 = vsyncpa [#allocation4], 0 }
   0xc   :  { %19 = vsyncpa [#allocation4 + $0x1], 0 }
   0xd   :  { %20 = vsyncpa [#allocation11], 0 }
   0xe   :  { %22 = vsyncpa [#allocation11 + $0x1], 0  ;;  %s1893_s24 = smov 0   ;;  %s1895_s25 = smov 0  }
   0xf   :  { %s1897_s26 = smov 0   ;;  %s1899_s27 = smov 0  }
  0x10   :  { %s1901_s28 = smov 0   ;;  %s1903_s29 = smov 0  }
  0x11   :  { %s1905_s30 = smov 0   ;;  %s1907_s8 = smov 0  }
  0x12   :  { %s1909_s9 = smov 0   ;;  %s1911_s10 = smov 0  }
  0x13   :  { %s1913_s11 = smov 0  }
  0x14 LB: > { %2428 = sst [smem:[#allocation18_spill]] %s1819_s29  ;;  %s1949_s12 = sadd.s32 4294967295, %s1839_s11   ;;  %s1839_s11 = sphi %s1913_s11, %s28_s11   ;;  %s1835_s10 = sphi %s1911_s10, %s2484_s10   ;;  %s1831_s9 = sphi %s1909_s9, %s2483_s9   ;;  %s1827_s8 = sphi %s1907_s8, %s2473_s8   ;;  %s1823_s30 = sphi %s1905_s30, %s2482_s30   ;;  %s1819_s29 = sphi %s1903_s29, %s2481_s29   ;;  %s1815_s28 = sphi %s1901_s28, %s2480_s28   ;;  %s1811_s27 = sphi %s1899_s27, %s2479_s27   ;;  %s1807_s26 = sphi %s1897_s26, %s2478_s26   ;;  %s1803_s25 = sphi %s1895_s25, %s2477_s25   ;;  %s1799_s24 = sphi %s1893_s24, %s2476_s24  }
  0x15   : > { %2429 = sst [smem:[#allocation19_spill]] %s1823_s30  ;;  %s2400_s13 = sadd.s32 4294967294, %s1839_s11  }
  0x16   : > { %2430 = sst [smem:[#allocation20_spill]] %s1835_s10  ;;  %s37_s14 = sadd.s32 1, %s1831_s9 }
  0x17   : > { %s40_s15 = sadd.s32 1, %s1835_s10  ;;  %p38_p0 = scmp.ge.s32.totalorder %s37_s14, 2 }
  0x18   : > { %s49_s16 = sadd.s32 1, %s1819_s29  ;;  %p56_p1 = scmp.ne.s32.totalorder %s1819_s29, %s1815_s28 }
  0x19   : > { %p57_p2 = scmp.eq.s32.totalorder %s1839_s11, 0  ;;  %s2486_s14 = smov (%p38_p0, %s37_s14), 0 }
  0x1a   : > { %2431 = sst [smem:[#allocation21_spill]] %s2486_s14  ;;  %s2488_s15 = smov (!%p38_p0, %s40_s15), %s1835_s10 }
  0x1b   : > { %s45_s17 = ssub.s32 %s1831_s9, %s2486_s14  ;;  %p1968_p3 = por %p57_p2, %p56_p1 }
  0x1c   : > { %p42_p4 = scmp.ge.s32.totalorder %s2488_s15, 2  ;;  %p2408_p5 = scmp.ne.s32.totalorder %s1815_s28, %s1811_s27 }
  0x1d   : > { %p115_p6 = scmp.eq.s32.totalorder %s45_s17, 0  ;;  %s117_s19 = sadd.s32 1, %s1807_s26 }
  0x1e   : > { %s2490_s15 = smov (%p42_p4, %s2488_s15), 0  ;;  %p124_p7 = scmp.ne.s32.totalorder %s1807_s26, %s1803_s25 }
  0x1f   : > { %2433 = sst [smem:[#allocation22_spill]] %s2490_s15  ;;  %s44_s21 = ssub.s32 %s1835_s10, %s2490_s15 }
  0x20   : > { %s1978_s20 = scalar_select %p115_p6, %s1807_s26, %s117_s19  }
  0x21   : > { %s46_s22 = sor.u32 %s45_s17, %s44_s21  ;;  %p1988_p10 = por %p124_p7, %p57_p2 }
  0x22   : > { %2434 = sst [smem:[#allocation23_spill]] %s1978_s20  ;;  %p47_p9 = scmp.eq.s32.totalorder %s46_s22, 0 }
  0x23   : > { %p182_p11 = scmp.eq.s32.totalorder %s1949_s12, 3  ;;  %p188_p12 = scmp.eq.s32.totalorder %s2400_s13, 3 }
  0x24   : > { %s1996_s14 = scalar_select %p47_p9, %s1819_s29, %s49_s16  }
  0x25   : > { %p2001_p13 = por %p182_p11, %p56_p1  ;;  %p2008_p0 = por %p188_p12, %p2408_p5 }
  0x26   : > { %2436 = sst [smem:[#allocation24_spill]] %s1996_s14  ;;  %p1336_p2 = scmp.lt.s32.totalorder %s1839_s11, 4 }
  0x27   : > { %s2437_s19 = scalar_select %p2001_p13, 1, 0 }
  0x28   : > { %s2439_s17 = scalar_select %p2008_p0, 1, 0 }
  0x29   : > { %2438 = sst [smem:[#allocation25_spill]] %s2437_s19  ;;  %s280_s21 = sand.u32 1, %s1839_s11  }
  0x2a   : > { %s282_s22 = sand.u32 1, %s1819_s29   ;;  %s1204_s15 = sshll.u32 %s1831_s9, 1 }
  0x2b   : > { %s1203_s13 = sshll.u32 %s282_s22, 4  ;;  %s1205_s16 = sshll.u32 %s1835_s10, 2 }
  0x2c   : > { %s290_s14 = sadd.s32 %s1205_s16, %s1204_s15  ;;  %s284_s20 = scalar_lea.vmem [#allocation2], %s1203_s13 }
  0x2d   : > { %s294_s5 = sshll.u32 %s284_s20, 4  ;;  %s1206_s7 = sshll.u32 %s290_s14, 7  ;;  %s2017_s5 = int_to_ptr.vmem [resolvable:$true] %s294_s5 }
  0x2e   : > { %s2440_s0 = sld [smem:[#allocation26_spill]]  ;;  %p2028_p1 = pnand %p1336_p2, %p1968_p3 }
  0x2f   : > { %p2036_p4 = pnand %p1336_p2, %p1988_p10  ;;  %s303_s6 = sand.u32 1, %s1807_s26  }
  0x30   : > { %s2043_s14 = scalar_lea.sflag [#allocation3], %s280_s21  ;;  %p1533_p3 = pneg %p2028_p1 }
  0x31   : > { %s2442_s13 = scalar_select %p2036_p4, 1, 0 }
  0x34   : > { %s2022_s30 = scalar_lea.hbm %s2440_s0, %s1206_s7  ;;  %s2041_s7 = sshll.u32 %s303_s6, 3 }
  0x35   : > { %s1531_s15 = scalar_lea.hbm %s2022_s30, 256  ;;  %s1536_s23 = scalar_lea.hbm %s2440_s0, 1024 }
  0x36   : > { %p1532_p6 = scmp.ne.s32.totalorder %s2022_s30, %s1531_s15  ;;  %p1537_p10 = scmp.lt.u32.totalorder %s2022_s30, %s2440_s0 }
  0x37   : > { %p1538_p11 = scmp.lt.u32.totalorder %s1536_s23, %s1531_s15  ;;  %p1540_p2 = scmp.lt.u32.totalorder %s1531_s15, %s2022_s30 }
  0x38   : > { %p1534_p7 = pnand %p1533_p3, %p1532_p6 }
  0x39   : > { %p1539_p12 = por %p1538_p11, %p1537_p10 }
  0x3a   : > { %p1535_p9 = pneg %p1534_p7 }
  0x3b   : > { %p1541_p8 = por %p1540_p2, %p1539_p12 }
  0x3d   : > { %p1542_p5 = pnand %p1541_p8, %p1535_p9 }
  0x3f   : > { %1545 = shalt.err (!%p1542_p5)
}
  0x40   : > { %s1546_s21 = scalar_lea.vmem %s2017_s5, 256  ;;  %s1841_s6 = smov [#allocation2]  }
  0x41   : > { %p1547_p6 = scmp.ne.s32.totalorder %s2017_s5, %s1546_s21  ;;  %s1551_s18 = sshll.u32 %s1841_s6, 4  ;;  %s1552_s18 = int_to_ptr.vmem [resolvable:$false] %s1551_s18 }
  0x42   : > { %s1553_s20 = scalar_lea.vmem %s1552_s18, 512  ;;  %p1554_p13 = scmp.lt.s32.totalorder %s2017_s5, %s1552_s18 }
  0x43   : > { %p1549_p7 = pnand %p1547_p6, %p1533_p3  ;;  %p1555_p10 = scmp.lt.s32.totalorder %s1553_s20, %s1546_s21 }
  0x45   : > { %p1550_p0 = pneg %p1549_p7  ;;  %p1556_p11 = por %p1555_p10, %p1554_p13 }
  0x47   : > { %p1557_p12 = pnand %p1556_p11, %p1550_p0 }
  0x49   : > { %1560 = shalt.err (!%p1557_p12)
}
  0x4a   : > { %1318 = dma.hbm_to_vmem [thread:$0]  (!%p2028_p1), %s2022_s30, 256, %s2017_s5, %s2043_s14  }
  0x4b   : > { %s1208_s15 = sshll.u32 %s1831_s9, 7  ;;  %s305_s23 = scalar_lea.vmem [#allocation7], %s2041_s7 }
  0x4c   : > { %s312_s19 = sshll.u32 %s305_s23, 4  ;;  %s2443_s3 = sld [smem:[#allocation29_spill]]  ;;  %s313_s19 = int_to_ptr.vmem [resolvable:$true] %s312_s19 }
  0x4d   : > { %p2413_p8 = pneg %p2036_p4 }
  0x52   : > { %s2078_s6 = scalar_lea.hbm %s2443_s3, %s1208_s15  ;;  %s1566_s18 = scalar_lea.hbm %s2443_s3, 256 }
  0x53   : > { %s1561_s22 = scalar_lea.hbm %s2078_s6, 128  ;;  %p1567_p1 = scmp.lt.u32.totalorder %s2078_s6, %s2443_s3 }
  0x54   : > { %p1562_p5 = scmp.ne.s32.totalorder %s2078_s6, %s1561_s22  ;;  %p1568_p3 = scmp.lt.u32.totalorder %s1566_s18, %s1561_s22 }
  0x55   : > { %p1570_p2 = scmp.lt.u32.totalorder %s1561_s22, %s2078_s6 }
  0x56   : > { %p1564_p13 = pnand %p2413_p8, %p1562_p5  ;;  %p1569_p9 = por %p1568_p3, %p1567_p1 }
  0x58   : > { %p1565_p0 = pneg %p1564_p13  ;;  %p1571_p6 = por %p1570_p2, %p1569_p9 }
  0x5a   : > { %p1572_p7 = pnand %p1571_p6, %p1565_p0 }
  0x5c   : > { %1575 = shalt.err (!%p1572_p7)
}
  0x5d   : > { %s1576_s16 = scalar_lea.vmem %s313_s19, 128  ;;  %s1842_s21 = smov [#allocation7]  }
  0x5e   : > { %p1577_p10 = scmp.ne.s32.totalorder %s313_s19, %s1576_s16  ;;  %s1581_s5 = sshll.u32 %s1842_s21, 4  ;;  %s1582_s5 = int_to_ptr.vmem [resolvable:$false] %s1581_s5 }
  0x5f   : > { %s1583_s30 = scalar_lea.vmem %s1582_s5, 256  ;;  %p1584_p5 = scmp.lt.s32.totalorder %s313_s19, %s1582_s5 }
  0x60   : > { %p1579_p11 = pnand %p1577_p10, %p2413_p8  ;;  %p1585_p13 = scmp.lt.s32.totalorder %s1583_s30, %s1576_s16 }
  0x62   : > { %p1580_p12 = pneg %p1579_p11  ;;  %p1586_p1 = por %p1585_p13, %p1584_p5 }
  0x64   : > { %p1587_p3 = pnand %p1586_p1, %p1580_p12 }
  0x66   : > { %1590 = shalt.err (!%p1587_p3)
}
  0x67   : > { %1321 = dma.hbm_to_vmem [thread:$0]  (!%p2036_p4), %s2078_s6, 128, %s313_s19, %s2043_s14  }
  0x68   : > { %p2412_p0 = scmp.eq.s32.totalorder %s1949_s12, 0  ;;  %p1200_p9 = scmp.ge.s32.totalorder %s1839_s11, 1 }
  0x69   : > { %p251_p2 = scmp.lt.s32.totalorder %s1839_s11, 5  ;;  %p2444_p6 = scmp.ne.s32.totalorder %s1815_s28, %s1811_s27 }
  0x6a   : > { %p2446_p10 = scmp.ne.s32.totalorder %s1803_s25, %s1799_s24  ;;  %s1843_s19 = smov [#allocation5]  }
  0x6b   : > { %p2110_p7 = por %p2412_p0, %p2444_p6  ;;  %p2123_p12 = pnand %p1200_p9, %p251_p2 }
  0x6c   : > { %p2119_p11 = por %p2446_p10, %p2412_p0  ;;  %s266_s6 = sshll.u32 %s1843_s19, 4  ;;  %s2127_s6 = int_to_ptr.vmem [resolvable:$true] %s266_s6 }
  0x6d   : > { %s2445_s22 = scalar_select %p2110_p7, 1, 0 }
  0x6e   : > { %s2447_s18 = scalar_select %p2119_p11, 1, 0 }
  0x6f   : > { %s2448_s20 = scalar_select %p2123_p12, 1, 0 }
  0x70   : > { %p1311_p5 = pneg %p2123_p12  ;;  %s323_s24 = scalar_lea.vmem [#allocation8], %s2041_s7 }
  0x71   : > { %s330_s16 = sshll.u32 %s323_s24, 4  ;;  %s2143_s30 = scalar_lea.hbm %s2395_s4, %s1208_s15  ;;  %s2145_s16 = int_to_ptr.vmem [resolvable:$true] %s330_s16 }
  0x72   : > { %p2133_p13 = pnand %p1311_p5, %p2412_p0  ;;  %s2450_s2 = sld [smem:[#allocation28_spill]] }
  0x74   : > { %p1593_p3 = pneg %p2133_p13 }
  0x78   : > { %s1591_s3 = scalar_lea.hbm %s2450_s2, 8192 }
  0x79   : > { %p1592_p1 = scmp.ne.s32.totalorder %s2450_s2, %s1591_s3  ;;  %p1598_p6 = scmp.lt.u32.totalorder %s1591_s3, %s2450_s2 }
  0x7b   : > { %p1594_p9 = pnand %p1593_p3, %p1592_p1 }
  0x7d   : > { %p1595_p2 = pneg %p1594_p9 }
  0x7f   : > { %p1600_p10 = pnand %p1598_p6, %p1595_p2 }
  0x81   : > { %1603 = shalt.err (!%p1600_p10)
}
  0x82   : > { %s1604_s15 = scalar_lea.vmem %s2127_s6, 8192  ;;  %p1612_p11 = scmp.lt.s32.totalorder %s2127_s6, %s2127_s6 }
  0x83   : > { %p1605_p5 = scmp.ne.s32.totalorder %s2127_s6, %s1604_s15  ;;  %p1613_p7 = scmp.lt.s32.totalorder %s1604_s15, %s1604_s15 }
  0x85   : > { %p1607_p0 = pnand %p1605_p5, %p1593_p3  ;;  %p1614_p12 = por %p1613_p7, %p1612_p11 }
  0x87   : > { %p1608_p8 = pneg %p1607_p0 }
  0x89   : > { %p1615_p4 = pnand %p1614_p12, %p1608_p8 }
  0x8b   : > { %1618 = shalt.err (!%p1615_p4)
}
  0x8c   : > { %s1844_s0 = smov 256   ;;  %s1845_s3 = smov 16  }
  0x8d   : > { %1314 = dma.hbm_to_vmem [thread:$0]  (!%p2133_p13), %s2450_s2, 8192, %s2127_s6, [#allocation6], %s1844_s0, %s1844_s0, %s1845_s3  }
  0x8e   : > { %s1619_s21 = scalar_lea.hbm %s2143_s30, 128  ;;  %p2451_p1 = scmp.ne.s32.totalorder %s2442_s13, 0 }
  0x8f   : > { %p1620_p0 = scmp.ne.s32.totalorder %s2143_s30, %s1619_s21  ;;  %s1624_s7 = scalar_lea.hbm %s2395_s4, 256 }
  0x90   : > { %p2452_p7 = pneg %p2451_p1  ;;  %p1625_p11 = scmp.lt.u32.totalorder %s2143_s30, %s2395_s4 }
  0x91   : > { %p1626_p12 = scmp.lt.u32.totalorder %s1624_s7, %s1619_s21  ;;  %p1628_p9 = scmp.lt.u32.totalorder %s1619_s21, %s2143_s30 }
  0x92   : > { %p1622_p8 = pnand %p1620_p0, %p2452_p7 }
  0x93   : > { %p1627_p3 = por %p1626_p12, %p1625_p11 }
  0x94   : > { %p1623_p4 = pneg %p1622_p8 }
  0x95   : > { %p1629_p2 = por %p1628_p9, %p1627_p3 }
  0x97   : > { %p1630_p6 = pnand %p1629_p2, %p1623_p4 }
  0x99   : > { %1633 = shalt.err (!%p1630_p6)
}
  0x9a   : > { %s1634_s6 = scalar_lea.vmem %s2145_s16, 128  ;;  %p2453_p10 = pmov %p2452_p7 }
  0x9b   : > { %p1635_p13 = scmp.ne.s32.totalorder %s2145_s16, %s1634_s6  ;;  %s1846_s23 = smov [#allocation8]  }
  0x9c   : > { %s1639_s0 = sshll.u32 %s1846_s23, 4  ;;  %s1640_s0 = int_to_ptr.vmem [resolvable:$false] %s1639_s0 }
  0x9d   : > { %p1637_p5 = pnand %p1635_p13, %p2453_p10  ;;  %s1641_s3 = scalar_lea.vmem %s1640_s0, 256 }
  0x9e   : > { %p1642_p7 = scmp.lt.s32.totalorder %s2145_s16, %s1640_s0  ;;  %p1643_p8 = scmp.lt.s32.totalorder %s1641_s3, %s1634_s6 }
  0x9f   : > { %p1638_p0 = pneg %p1637_p5 }
  0xa0   : > { %p1644_p11 = por %p1643_p8, %p1642_p7 }
  0xa2   : > { %p1645_p12 = pnand %p1644_p11, %p1638_p0 }
  0xa4   : > { %1648 = shalt.err (!%p1645_p12)
}
  0xa5   : > { %1324 = dma.hbm_to_vmem [thread:$0]  (!%p2451_p1), %s2143_s30, 128, %s2145_s16, %s2043_s14  }
  0xa6   : > { %p2454_p4 = scmp.ne.s32.totalorder %s2448_s20, 0 }
  0xa7   : > { %s2420_s29 = sand.u32 (!%p2454_p4), 1, %s1949_s12   ;;  %s2196_s10 = sand.u32 (!%p2454_p4), 1, %s1815_s28  }
  0xa8   : > { %339 = sbr.rel (%p2454_p4) target bundleno = 746 (0x2ea), region = 40  ;;  %s1212_s21 = sshll.u32 (!%p2454_p4), %s2196_s10, 4 }
  0xa9   : > { %s342_s5 = scalar_lea.sflag (!%p2454_p4), [#allocation3], %s2420_s29  ;;  %s345_s19 = scalar_lea.vmem (!%p2454_p4), [#allocation2], %s1212_s21 }
  0xaa   : > { %p2455_p3 = scmp.ne.s32.totalorder (!%p2454_p4), %s2445_s22, 0 }
  0xaf   : > { %1778 = dma.done.wait (%p2455_p3), %s342_s5, 256  }
  0xb0   : > { %1780 = vsyncadd (%p2455_p3), %s342_s5, 4294967040  ;;  %p2456_p1 = scmp.eq.s32.totalorder %s1949_s12, 0 }
  0xb2   : > { %1782 = dma.done.wait (%p2456_p1), [#allocation6], 8192   ;;  %p2457_p9 = pmov %p2456_p1 }
  0xb3   : > { %s356_s13 = sand.u32 1, %s1803_s25   ;;  %p2458_p2 = scmp.ne.s32.totalorder %s2447_s18, 0 }
  0xb4   : > { %1784 = vsyncadd (%p2457_p9), [#allocation6], 4294959104  ;;  %s2210_s14 = sshll.u32 %s356_s13, 3 }
  0xb5   : > { %s358_s20 = scalar_lea.vmem [#allocation7], %s2210_s14 }
  0xb6   : > { %1786 = dma.done.wait (%p2458_p2), %s342_s5, 256  }
  0xb7   : > { %1788 = vsyncadd (%p2458_p2), %s342_s5, 4294967040  ;;  %v2217_v0 = vld [vmem:[%s345_s19] sm:$0xff]  ;;  %v2219_v1 = vld [vmem:[%s345_s19 + $0x8] sm:$0xff]  ;;  %s2459_s1 = sld [smem:[#allocation27_spill]]  ;;  %s1217_s16 = sshll.u32 %s2196_s10, 2 }
  0xb8   : > { %v420_v2 = vmul.f32 %v2217_v0, %v2217_v0  ;;  %v421_v3 = vmul.f32 %v2219_v1, %v2219_v1  ;;  %v1433_v4 = vld [vmem:[#allocation5 + $0x4] ss:$16 sps:$4 sm:$0xff]   ;;  %v1435_v5 = vld [vmem:[#allocation5 + $0xc] ss:$16 sps:$4 sm:$0xff]   ;;  %v1437_v6 = vld [vmem:[#allocation5] ss:$16 sps:$4 sm:$0xff]  }
  0xb9   : > { %831 = vmatprep.subr.bf16.mxu0 %v1433_v4  ;;  %v1438_v8 = vld [vmem:[#allocation5 + $0x8] ss:$16 sps:$4 sm:$0xff]   ;;  %872 = vmatprep.subr.bf16.mxu1 %v1435_v5  ;;  %v1439_v9 = vld [vmem:[#allocation5 + $0x24] ss:$16 sps:$4 sm:$0xff]   ;;  %v1441_v10 = vld [vmem:[#allocation5 + $0x2c] ss:$16 sps:$4 sm:$0xff]  }
  0xba   : > { %v422_v7 = vadd.f32 %v421_v3, %v420_v2  ;;  %832 = vmatpush1.bf16.msra.mxu0 %v1437_v6  ;;  %873 = vmatpush1.bf16.msra.mxu1 %v1438_v8  ;;  %v1443_v11 = vld [vmem:[#allocation5 + $0x20] ss:$16 sps:$4 sm:$0xff]   ;;  %v1444_v12 = vld [vmem:[#allocation5 + $0x28] ss:$16 sps:$4 sm:$0xff]   ;;  %v1445_v13 = vld [vmem:[#allocation5 + $0x44] ss:$16 sps:$4 sm:$0xff]  }
  0xbb   : > { %833 = vmatprep.subr.bf16.mxu0 %v1439_v9  ;;  %874 = vmatprep.subr.bf16.mxu1 %v1441_v10  ;;  %v1447_v14 = vld [vmem:[#allocation5 + $0x4c] ss:$16 sps:$4 sm:$0xff]   ;;  %v1449_v15 = vld [vmem:[#allocation5 + $0x40] ss:$16 sps:$4 sm:$0xff]   ;;  %v1450_v16 = vld [vmem:[#allocation5 + $0x48] ss:$16 sps:$4 sm:$0xff]   ;;  %v433_v9 = vlaneseq }
  0xbc   : > { %423 = vadd.xlane.f32.xlu0 %v422_v7  ;;  %v1451_v17 = vld [vmem:[#allocation5 + $0x64] ss:$16 sps:$4 sm:$0xff]   ;;  %v1453_v18 = vld [vmem:[#allocation5 + $0x6c] ss:$16 sps:$4 sm:$0xff]   ;;  %v1455_v19 = vld [vmem:[#allocation5 + $0x60] ss:$16 sps:$4 sm:$0xff]  }
  0xbd   : > { %v1456_v20 = vld [vmem:[#allocation5 + $0x68] ss:$16 sps:$4 sm:$0xff]   ;;  %v1457_v21 = vld [vmem:[#allocation5 + $0x84] ss:$16 sps:$4 sm:$0xff]   ;;  %v1459_v22 = vld [vmem:[#allocation5 + $0x8c] ss:$16 sps:$4 sm:$0xff]  }
  0xbe   : > { %834 = vmatpush1.bf16.msra.mxu0 %v1443_v11  ;;  %875 = vmatpush1.bf16.msra.mxu1 %v1444_v12  ;;  %v1461_v23 = vld [vmem:[#allocation5 + $0x80] ss:$16 sps:$4 sm:$0xff]   ;;  %v1462_v24 = vld [vmem:[#allocation5 + $0x88] ss:$16 sps:$4 sm:$0xff]   ;;  %v1463_v25 = vld [vmem:[#allocation5 + $0xa4] ss:$16 sps:$4 sm:$0xff]  }
  0xbf   : > { %835 = vmatprep.subr.bf16.mxu0 %v1445_v13  ;;  %876 = vmatprep.subr.bf16.mxu1 %v1447_v14  ;;  %v1465_v26 = vld [vmem:[#allocation5 + $0xac] ss:$16 sps:$4 sm:$0xff]   ;;  %v1467_v27 = vld [vmem:[#allocation5 + $0xa0] ss:$16 sps:$4 sm:$0xff]   ;;  %v1468_v28 = vld [vmem:[#allocation5 + $0xa8] ss:$16 sps:$4 sm:$0xff]  }
  0xc0   : > { %v1469_v29 = vld [vmem:[#allocation5 + $0xc4] ss:$16 sps:$4 sm:$0xff]   ;;  %v1471_v30 = vld [vmem:[#allocation5 + $0xcc] ss:$16 sps:$4 sm:$0xff]   ;;  %v1473_v31 = vld [vmem:[#allocation5 + $0xc0] ss:$16 sps:$4 sm:$0xff]  }
  0xc1   : > { %v1474_v32 = vld [vmem:[#allocation5 + $0xc8] ss:$16 sps:$4 sm:$0xff]   ;;  %v1475_v33 = vld [vmem:[#allocation5 + $0xe4] ss:$16 sps:$4 sm:$0xff]   ;;  %v1477_v34 = vld [vmem:[#allocation5 + $0xec] ss:$16 sps:$4 sm:$0xff]  }
  0xc2   : > { %836 = vmatpush1.bf16.msra.mxu0 %v1449_v15  ;;  %877 = vmatpush1.bf16.msra.mxu1 %v1450_v16  ;;  %v1479_v35 = vld [vmem:[#allocation5 + $0xe0] ss:$16 sps:$4 sm:$0xff]   ;;  %v1480_v36 = vld [vmem:[#allocation5 + $0xe8] ss:$16 sps:$4 sm:$0xff]   ;;  %v1481_v37 = vld [vmem:[#allocation5 + $0x104] ss:$16 sps:$4 sm:$0xff]  }
  0xc3   : > { %837 = vmatprep.subr.bf16.mxu0 %v1451_v17  ;;  %878 = vmatprep.subr.bf16.mxu1 %v1453_v18  ;;  %v1483_v38 = vld [vmem:[#allocation5 + $0x10c] ss:$16 sps:$4 sm:$0xff]   ;;  %v1485_v39 = vld [vmem:[#allocation5 + $0x100] ss:$16 sps:$4 sm:$0xff]   ;;  %v1486_v40 = vld [vmem:[#allocation5 + $0x108] ss:$16 sps:$4 sm:$0xff]  }
  0xc4   : > { %v1487_v41 = vld [vmem:[#allocation5 + $0x124] ss:$16 sps:$4 sm:$0xff]   ;;  %v1489_v42 = vld [vmem:[#allocation5 + $0x12c] ss:$16 sps:$4 sm:$0xff]   ;;  %v1491_v43 = vld [vmem:[#allocation5 + $0x120] ss:$16 sps:$4 sm:$0xff]  }
  0xc5   : > { %v1492_v44 = vld [vmem:[#allocation5 + $0x128] ss:$16 sps:$4 sm:$0xff]   ;;  %v1493_v45 = vld [vmem:[#allocation5 + $0x144] ss:$16 sps:$4 sm:$0xff]   ;;  %v1495_v46 = vld [vmem:[#allocation5 + $0x14c] ss:$16 sps:$4 sm:$0xff]  }
  0xc6   : > { %838 = vmatpush1.bf16.msra.mxu0 %v1455_v19  ;;  %879 = vmatpush1.bf16.msra.mxu1 %v1456_v20  ;;  %v1497_v47 = vld [vmem:[#allocation5 + $0x140] ss:$16 sps:$4 sm:$0xff]   ;;  %v1498_v48 = vld [vmem:[#allocation5 + $0x148] ss:$16 sps:$4 sm:$0xff]   ;;  %v1499_v49 = vld [vmem:[#allocation5 + $0x164] ss:$16 sps:$4 sm:$0xff]  }
  0xc7   : > { %839 = vmatprep.subr.bf16.mxu0 %v1457_v21  ;;  %880 = vmatprep.subr.bf16.mxu1 %v1459_v22  ;;  %v1501_v50 = vld [vmem:[#allocation5 + $0x16c] ss:$16 sps:$4 sm:$0xff]   ;;  %v1503_v51 = vld [vmem:[#allocation5 + $0x160] ss:$16 sps:$4 sm:$0xff]   ;;  %v1504_v52 = vld [vmem:[#allocation5 + $0x168] ss:$16 sps:$4 sm:$0xff]  }
  0xc8   : > { %v1505_v53 = vld [vmem:[#allocation5 + $0x184] ss:$16 sps:$4 sm:$0xff]   ;;  %v1507_v54 = vld [vmem:[#allocation5 + $0x18c] ss:$16 sps:$4 sm:$0xff]   ;;  %v1509_v55 = vld [vmem:[#allocation5 + $0x180] ss:$16 sps:$4 sm:$0xff]  }
  0xc9   : > { %v1510_v56 = vld [vmem:[#allocation5 + $0x188] ss:$16 sps:$4 sm:$0xff]   ;;  %v1511_v57 = vld [vmem:[#allocation5 + $0x1a4] ss:$16 sps:$4 sm:$0xff]   ;;  %v1513_v58 = vld [vmem:[#allocation5 + $0x1ac] ss:$16 sps:$4 sm:$0xff]  }
  0xca   : > { %840 = vmatpush1.bf16.msra.mxu0 %v1461_v23  ;;  %881 = vmatpush1.bf16.msra.mxu1 %v1462_v24  ;;  %v1515_v59 = vld [vmem:[#allocation5 + $0x1a0] ss:$16 sps:$4 sm:$0xff]   ;;  %v1516_v60 = vld [vmem:[#allocation5 + $0x1a8] ss:$16 sps:$4 sm:$0xff]   ;;  %v1517_v61 = vld [vmem:[#allocation5 + $0x1c4] ss:$16 sps:$4 sm:$0xff]  }
  0xcb   : > { %841 = vmatprep.subr.bf16.mxu0 %v1463_v25  ;;  %882 = vmatprep.subr.bf16.mxu1 %v1465_v26  ;;  %v1519_v62 = vld [vmem:[#allocation5 + $0x1cc] ss:$16 sps:$4 sm:$0xff]   ;;  %v1521_v63 = vld [vmem:[#allocation5 + $0x1c0] ss:$16 sps:$4 sm:$0xff]   ;;  %v1522_v2 = vld [vmem:[#allocation5 + $0x1c8] ss:$16 sps:$4 sm:$0xff]  }
  0xcc   : > { %v1523_v3 = vld [vmem:[#allocation5 + $0x1e4] ss:$16 sps:$4 sm:$0xff]   ;;  %v1525_v4 = vld [vmem:[#allocation5 + $0x1ec] ss:$16 sps:$4 sm:$0xff]   ;;  %v1527_v5 = vld [vmem:[#allocation5 + $0x1e0] ss:$16 sps:$4 sm:$0xff]  }
  0xcd   : > { %v1528_v6 = vld [vmem:[#allocation5 + $0x1e8] ss:$16 sps:$4 sm:$0xff]   ;;  %v434_v11 = vshrl.u32 %v433_v9, 7  ;;  %v431_v14 = vld [vmem:[%s2459_s1] sm:$0x3]  ;;  %s2460_s30 = sld [smem:[#allocation19_spill]] }
  0xce   : > { %842 = vmatpush1.bf16.msra.mxu0 %v1467_v27  ;;  %883 = vmatpush1.bf16.msra.mxu1 %v1468_v28  ;;  %s2419_s7 = smov 64   ;;  %s2235_s24 = scalar_lea.vmem [#allocation12], %s1217_s16 }
  0xcf   : > { %843 = vmatprep.subr.bf16.mxu0 %v1469_v29  ;;  %884 = vmatprep.subr.bf16.mxu1 %v1471_v30  ;;  %v435_v12 = vsub.s32 0, %v434_v11  ;;  %v439_v13 = vsub.s32 1, %v434_v11  ;;  %s1289_s15 = sshll.u32 %s1827_s8, 1  ;;  %s1216_s6 = sshll.u32 %s2196_s10, 3 }
  0xd0   : > { %s367_s0 = scalar_lea.vmem [#allocation8], %s2210_s14  ;;  %s1287_s3 = sshll.u32 %s1827_s8, 2 }
  0xd1   : > { %v436_v15 = vrot.slane %v431_v14, %v435_v12  ;;  %v440_v16 = vrot.slane %v431_v14, %v439_v13  ;;  %s2248_s21 = scalar_lea.vmem [#allocation9], %s1216_s6  ;;  %s410_s13 = scalar_lea.vmem [#allocation10], %s1217_s16 }
  0xd2   : > { %844 = vmatpush1.bf16.msra.mxu0 %v1473_v31  ;;  %885 = vmatpush1.bf16.msra.mxu1 %v1474_v32  ;;  %v913_v31 = vld [vmem:[%s358_s20] sm:$0xff]  ;;  %v914_v32 = vld [vmem:[%s367_s0] sm:$0xff]  ;;  %s964_s5 = sshll.u32 %s2248_s21, 4  ;;  %s982_s22 = sshll.u32 %s410_s13, 4  ;;  %s2256_s5 = int_to_ptr.vmem [resolvable:$true] %s964_s5  ;;  %s2263_s22 = int_to_ptr.vmem [resolvable:$true] %s982_s22 }
  0xd3   : > { %845 = vmatprep.subr.bf16.mxu0 %v1475_v33  ;;  %886 = vmatprep.subr.bf16.mxu1 %v1477_v34  ;;  %s2242_s23 = sadd.s32 %s2460_s30, %s1289_s15  ;;  %s961_s20 = sadd.s32 %s2460_s30, %s1287_s3 }
  0xd4   : > { %s1290_s19 = sshll.u32 %s2242_s23, 6  ;;  %s997_s18 = sshll.u32 %s2235_s24, 4  ;;  %s2270_s18 = int_to_ptr.vmem [resolvable:$true] %s997_s18 }
  0xd5   : > { %s2461_s15 = sld [smem:[#allocation31_spill]]  ;;  %s2462_s23 = sld [smem:[#allocation25_spill]] }
  0xd6   : > { %846 = vmatpush1.bf16.msra.mxu0 %v1479_v35  ;;  %887 = vmatpush1.bf16.msra.mxu1 %v1480_v36  ;;  %s1288_s16 = sshll.u32 %s961_s20, 6  ;;  %s2463_s0 = sld [smem:[#allocation32_spill]] }
  0xd7   : > { %847 = vmatprep.subr.bf16.mxu0 %v1481_v37  ;;  %888 = vmatprep.subr.bf16.mxu1 %v1483_v38  ;;  %s2465_s20 = sand.u32 1, %s1949_s12   ;;  %s1649_s2 = scalar_lea.vmem %s2263_s22, 64 }
  0xd8   : > { %s2280_s1 = scalar_lea.sflag [#allocation11], %s2465_s20  ;;  %p1650_p6 = scmp.ne.s32.totalorder %s2263_s22, %s1649_s2 }
  0xda   : > { %848 = vmatpush1.bf16.msra.mxu0 %v1485_v39  ;;  %889 = vmatpush1.bf16.msra.mxu1 %v1486_v40 }
  0xdb   : > { %849 = vmatprep.subr.bf16.mxu0 %v1487_v41  ;;  %890 = vmatprep.subr.bf16.mxu1 %v1489_v42  ;;  %s2261_s6 = scalar_lea.hbm %s2461_s15, %s1290_s19  ;;  %p2466_p13 = scmp.ne.s32.totalorder %s2462_s23, 0 }
  0xdc   : > { %s2268_s3 = scalar_lea.hbm %s2463_s0, %s1290_s19  ;;  %s1848_s19 = smov [#allocation10]  }
  0xdd   : > { %p1651_p10 = pnand %p1650_p6, %p2466_p13  ;;  %s1653_s30 = sshll.u32 %s1848_s19, 4  ;;  %s1654_s30 = int_to_ptr.vmem [resolvable:$false] %s1653_s30 }
  0xde   : > { %850 = vmatpush1.bf16.msra.mxu0 %v1491_v43  ;;  %891 = vmatpush1.bf16.msra.mxu1 %v1492_v44  ;;  %p1656_p0 = scmp.lt.s32.totalorder %s2263_s22, %s1654_s30 }
  0xdf   : > { %851 = vmatprep.subr.bf16.mxu0 %v1493_v45  ;;  %892 = vmatprep.subr.bf16.mxu1 %v1495_v46  ;;  %p1652_p5 = pneg %p1651_p10 }
  0xe2   : > { %852 = vmatpush1.bf16.msra.mxu0 %v1497_v47  ;;  %893 = vmatpush1.bf16.msra.mxu1 %v1498_v48 }
  0xe3   : > { %853 = vmatprep.subr.bf16.mxu0 %v1499_v49  ;;  %894 = vmatprep.subr.bf16.mxu1 %v1501_v50 }
  0xe6   : > { %854 = vmatpush1.bf16.msra.mxu0 %v1503_v51  ;;  %895 = vmatpush1.bf16.msra.mxu1 %v1504_v52 }
  0xe7   : > { %855 = vmatprep.subr.bf16.mxu0 %v1505_v53  ;;  %896 = vmatprep.subr.bf16.mxu1 %v1507_v54 }
  0xea   : > { %856 = vmatpush1.bf16.msra.mxu0 %v1509_v55  ;;  %897 = vmatpush1.bf16.msra.mxu1 %v1510_v56 }
  0xeb   : > { %857 = vmatprep.subr.bf16.mxu0 %v1511_v57  ;;  %898 = vmatprep.subr.bf16.mxu1 %v1513_v58 }
  0xee   : > { %858 = vmatpush1.bf16.msra.mxu0 %v1515_v59  ;;  %899 = vmatpush1.bf16.msra.mxu1 %v1516_v60 }
  0xef   : > { %859 = vmatprep.subr.bf16.mxu0 %v1517_v61  ;;  %900 = vmatprep.subr.bf16.mxu1 %v1519_v62 }
  0xf2   : > { %860 = vmatpush1.bf16.msra.mxu0 %v1521_v63  ;;  %901 = vmatpush1.bf16.msra.mxu1 %v1522_v2 }
  0xf3   : > { %861 = vmatprep.subr.bf16.mxu0 %v1523_v3  ;;  %902 = vmatprep.subr.bf16.mxu1 %v1525_v4 }
  0xf6   : > { %862 = vmatpush1.bf16.msra.mxu0 %v1527_v5  ;;  %903 = vmatpush1.bf16.msra.mxu1 %v1528_v6 }
 0x149   : > { %v424_v7 = vpop.xlane.xlu0 %423 }
 0x14a   : > { %v426_v8 = vmul.f32 0.00390625, %v424_v7 }
 0x14c   : > { %v427_v10 = vadd.f32 1e-05, %v426_v8 }
 0x14e   : > { %1529 = vrsqrt.f32 %v427_v10 }
 0x158   : > { %v1530_v17 = vpop.eup %1529 }
 0x159   : > { %v430_v18 = vmul.f32 %v1530_v17, %v2219_v1  ;;  %v429_v19 = vmul.f32 %v1530_v17, %v2217_v0 }
 0x15b   : > { %v444_v20 = vmul.f32 %v440_v16, %v430_v18  ;;  %v443_v21 = vmul.f32 %v436_v15, %v429_v19 }
 0x15d   : > { %v446_v22 = vpack.c.bf16 %v444_v20, %v444_v20  ;;  %v445_v23 = vpack.c.bf16 %v443_v21, %v443_v21 }
 0x15f   : > { %863 = vmatprep.mubr.bf16.mxu0 %v446_v22  ;;  %904 = vmatprep.mubr.bf16.mxu1 %v446_v22 }
 0x160   : > { %864 = vmatmul.mubr.bf16.vlgmr.msra.gmra.mrb[0].mxu0 %v445_v23  ;;  %905 = vmatmul.mubr.bf16.vlgmr.msra.gmra.mrb[0].mxu1 %v445_v23 }
 0x233   : > { %v865_v24 = vpop.f32.mrb[0].mxu0  ;;  %v906_v25 = vpop.f32.mrb[0].mxu1 }
 0x234   : > { %931 = vrot.lane.b32.xlu0 %v906_v25, %s2419_s7  ;;  %v908_v0 = vpop.f32.mrb[1].mxu1  ;;  %916 = vrot.lane.b32.xlu1 %v865_v24, %s2419_s7  ;;  %v867_v1 = vpop.f32.mrb[1].mxu0  ;;  %v915_v35 = vmul.f32 %v913_v31, %v865_v24  ;;  %v930_v36 = vmul.f32 %v913_v31, %v906_v25 }
 0x235   : > { %v937_v26 = vpack.c.bf16 %v908_v0, %v908_v0  ;;  %v869_v27 = vpop.f32.mrb[2].mxu0  ;;  %v910_v28 = vpop.f32.mrb[2].mxu1  ;;  %v922_v42 = vmul.f32 %v913_v31, %v867_v1 }
 0x236   : > { %v870_v29 = vpop.f32.mrb[3].mxu0  ;;  %v911_v30 = vpop.f32.mrb[3].mxu1 }
 0x237   : > { %938 = vst [vmem:[%s2235_s24] sm:$0xf] %v937_v26  ;;  %s1655_s24 = scalar_lea.vmem %s1654_s30, 128 }
 0x238   : > { %923 = vrot.lane.b32.xlu1 %v867_v1, %s2419_s7  ;;  %s2464_s7 = sld [smem:[#allocation30_spill]]  ;;  %p1657_p7 = scmp.lt.s32.totalorder %s1655_s24, %s1649_s2 }
 0x23a   : > { %p1658_p8 = por %p1657_p7, %p1656_p0 }
 0x23c   : > { %p1659_p11 = pnand %p1658_p8, %p1652_p5 }
 0x23e   : > { %s2276_s29 = scalar_lea.hbm %s2464_s7, %s1288_s16 }
 0x2a6   : > { %v932_v33 = vpop.permute.xlu0 %931  ;;  %v917_v34 = vpop.permute.xlu1 %916 }
 0x2a7   : > { %v933_v37 = vmul.f32 %v932_v33, %v914_v32  ;;  %v918_v38 = vmul.f32 %v917_v34, %v914_v32 }
 0x2a9   : > { %v934_v39 = vadd.f32 %v933_v37, %v930_v36  ;;  %v919_v40 = vadd.f32 %v918_v38, %v915_v35 }
 0x2aa   : > { %v924_v41 = vpop.permute.xlu1 %923 }
 0x2ab   : > { %v935_v43 = vpack.c.bf16 %v934_v39, %v934_v39  ;;  %v920_v44 = vpack.c.bf16 %v919_v40, %v919_v40  ;;  %v925_v45 = vmul.f32 %v924_v41, %v914_v32 }
 0x2ad   : > { %921 = vst [vmem:[%s2248_s21] sm:$0xf] %v920_v44  ;;  %v926_v46 = vadd.f32 %v925_v45, %v922_v42  ;;  %936 = vst [vmem:[%s410_s13] sm:$0xf] %v935_v43 }
 0x2ae   : > { %1662 = shalt.err (!%p1659_p11)
}
 0x2af   : > { %s1663_s12 = scalar_lea.hbm %s2261_s6, 64  ;;  %s1667_s8 = scalar_lea.hbm %s2461_s15, 256 }
 0x2b0   : > { %p1664_p12 = scmp.ne.s32.totalorder %s2261_s6, %s1663_s12  ;;  %p1668_p1 = scmp.lt.u32.totalorder %s2261_s6, %s2461_s15 }
 0x2b1   : > { %p1669_p9 = scmp.lt.u32.totalorder %s1667_s8, %s1663_s12  ;;  %p1671_p6 = scmp.lt.u32.totalorder %s1663_s12, %s2261_s6 }
 0x2b2   : > { %p1665_p4 = pnand %p1664_p12, %p2466_p13 }
 0x2b3   : > { %p1670_p2 = por %p1669_p9, %p1668_p1 }
 0x2b4   : > { %p1666_p3 = pneg %p1665_p4 }
 0x2b5   : > { %p1672_p10 = por %p1671_p6, %p1670_p2 }
 0x2b7   : > { %p1673_p5 = pnand %p1672_p10, %p1666_p3 }
 0x2b9   : > { %1676 = shalt.err (!%p1673_p5)
}
 0x2ba   : > { %1306 = dma.vmem_to_hbm [thread:$0]  (%p2466_p13), %s2263_s22, 64, %s2261_s6, %s2280_s1   ;;  %v927_v47 = vpack.c.bf16 %v926_v46, %v926_v46 }
 0x2bb   : > { %s1677_s2 = scalar_lea.vmem %s2270_s18, 64  ;;  %s1849_s19 = smov [#allocation12]  }
 0x2bc   : > { %p1678_p0 = scmp.ne.s32.totalorder %s2270_s18, %s1677_s2  ;;  %s1681_s30 = sshll.u32 %s1849_s19, 4  ;;  %s1682_s30 = int_to_ptr.vmem [resolvable:$false] %s1681_s30 }
 0x2bd   : > { %s1683_s24 = scalar_lea.vmem %s1682_s30, 128  ;;  %p1684_p11 = scmp.lt.s32.totalorder %s2270_s18, %s1682_s30 }
 0x2be   : > { %p1679_p7 = pnand %p1678_p0, %p2466_p13  ;;  %p1685_p12 = scmp.lt.s32.totalorder %s1683_s24, %s1677_s2 }
 0x2c0   : > { %p1680_p8 = pneg %p1679_p7  ;;  %p1686_p4 = por %p1685_p12, %p1684_p11 }
 0x2c2   : > { %p1687_p3 = pnand %p1686_p4, %p1680_p8 }
 0x2c4   : > { %1690 = shalt.err (!%p1687_p3)
}
 0x2c5   : > { %s1691_s22 = scalar_lea.hbm %s2268_s3, 64  ;;  %s1695_s13 = scalar_lea.hbm %s2463_s0, 256 }
 0x2c6   : > { %p1692_p1 = scmp.ne.s32.totalorder %s2268_s3, %s1691_s22  ;;  %p1696_p6 = scmp.lt.u32.totalorder %s2268_s3, %s2463_s0 }
 0x2c7   : > { %p1697_p10 = scmp.lt.u32.totalorder %s1695_s13, %s1691_s22  ;;  %p1699_p0 = scmp.lt.u32.totalorder %s1691_s22, %s2268_s3 }
 0x2c8   : > { %p1693_p9 = pnand %p1692_p1, %p2466_p13 }
 0x2c9   : > { %p1698_p5 = por %p1697_p10, %p1696_p6 }
 0x2ca   : > { %p1694_p2 = pneg %p1693_p9 }
 0x2cb   : > { %p1700_p7 = por %p1699_p0, %p1698_p5 }
 0x2cd   : > { %p1701_p8 = pnand %p1700_p7, %p1694_p2 }
 0x2cf   : > { %1704 = shalt.err (!%p1701_p8)
}
 0x2d0   : > { %1307 = dma.vmem_to_hbm [thread:$0]  (%p2466_p13), %s2270_s18, 64, %s2268_s3, %s2280_s1   ;;  %1283 = vst [vmem:[%s2248_s21 + $0x4] sm:$0xf] %v927_v47 }
 0x2d1   : > { %s940_s14 = scalar_lea.sflag [#allocation4], %s2196_s10  ;;  %s1705_s20 = scalar_lea.vmem %s2256_s5, 128 }
 0x2d2   : > { %p1706_p11 = scmp.ne.s32.totalorder %s2256_s5, %s1705_s20  ;;  %s1850_s2 = smov [#allocation9]  }
 0x2d3   : > { %s1709_s19 = sshll.u32 %s1850_s2, 4  ;;  %s1710_s19 = int_to_ptr.vmem [resolvable:$false] %s1709_s19 }
 0x2d4   : > { %p1707_p12 = pnand %p1706_p11, %p2466_p13  ;;  %s1711_s30 = scalar_lea.vmem %s1710_s19, 256 }
 0x2d5   : > { %p1712_p3 = scmp.lt.s32.totalorder %s2256_s5, %s1710_s19  ;;  %p1713_p1 = scmp.lt.s32.totalorder %s1711_s30, %s1705_s20 }
 0x2d6   : > { %p1708_p4 = pneg %p1707_p12 }
 0x2d7   : > { %p1714_p9 = por %p1713_p1, %p1712_p3 }
 0x2d9   : > { %p1715_p2 = pnand %p1714_p9, %p1708_p4 }
 0x2db   : > { %1718 = shalt.err (!%p1715_p2)
}
 0x2dc   : > { %s1719_s1 = scalar_lea.hbm %s2276_s29, 128  ;;  %s1723_s3 = scalar_lea.hbm %s2464_s7, 512 }
 0x2dd   : > { %p1720_p6 = scmp.ne.s32.totalorder %s2276_s29, %s1719_s1  ;;  %p1724_p0 = scmp.lt.u32.totalorder %s2276_s29, %s2464_s7 }
 0x2de   : > { %p1725_p7 = scmp.lt.u32.totalorder %s1723_s3, %s1719_s1  ;;  %p1727_p11 = scmp.lt.u32.totalorder %s1719_s1, %s2276_s29 }
 0x2df   : > { %p1721_p10 = pnand %p1720_p6, %p2466_p13 }
 0x2e0   : > { %p1726_p8 = por %p1725_p7, %p1724_p0 }
 0x2e1   : > { %p1722_p5 = pneg %p1721_p10 }
 0x2e2   : > { %p1728_p12 = por %p1727_p11, %p1726_p8 }
 0x2e4   : > { %p1729_p4 = pnand %p1728_p12, %p1722_p5 }
 0x2e6   : > { %1732 = shalt.err (!%p1729_p4)
}
 0x2e7   : > { %s1851_s6 = smov 128   ;;  %s1852_s12 = smov 4  }
 0x2e8   : > { %s2467_s13 = smov 64  }
 0x2e9   : > { %1305 = dma.vmem_to_hbm [thread:$0]  (%p2466_p13), %s2256_s5, 128, %s2276_s29, %s940_s14, %s2467_s13, %s1851_s6, %s1852_s12  }
 0x2ea PF: > { %p1338_p3 = scmp.ge.s32.totalorder %s1839_s11, 2  ;;  %s1009_s16 = sand.u32 1, %s1811_s27  }
 0x2eb   : > { %p2468_p1 = scmp.ne.s32.totalorder %s2439_s17, 0  ;;  %s1010_s8 = scalar_lea.sflag [#allocation4], %s1009_s16 }
 0x2ed   : > { %p1326_p9 = pnand %p1338_p3, %p2468_p1 }
 0x2ef   : > { %1790 = dma.done.wait (!%p1326_p9), %s1010_s8, 128  }
 0x2f0   : > { %1792 = vsyncadd (!%p1326_p9), %s1010_s8, 4294967168  ;;  %s2469_s20 = sadd.s32 4294967294, %s1839_s11  }
 0x2f1   : > { %s1018_s2 = sand.u32 1, %s2469_s20  }
 0x2f2   : > { %s1019_s19 = scalar_lea.sflag [#allocation11], %s1018_s2 }
 0x2f3   : > { %1794 = dma.done.wait (!%p1326_p9), %s1019_s19, 128  }
 0x2f4   : > { %1796 = vsyncadd (!%p1326_p9), %s1019_s19, 4294967168  ;;  %s28_s11 = sadd.s32 1, %s1839_s11   ;;  %s2470_s29 = sld [smem:[#allocation23_spill]] }
 0x2f5   : > { %p25_p13 = scmp.ge.s32.totalorder %s28_s11, 6   ;;  %s2471_s10 = sld [smem:[#allocation18_spill]] }
 0x2f6   : > { %s2472_s5 = sld [smem:[#allocation24_spill]]  ;;  %s2473_s8 = sld [smem:[#allocation20_spill]] }
 0x2f7   : > { %s2474_s17 = sld [smem:[#allocation21_spill]]  ;;  %s2475_s23 = sld [smem:[#allocation22_spill]] }
 0x2f8   : > { %s2476_s24 = smov %s1803_s25  ;;  %s2477_s25 = smov %s1807_s26 }
 0x2f9   : > { %s2479_s27 = smov %s1815_s28  ;;  %s2482_s30 = smov %s1831_s9 }
 0x2fa   : > { %s2478_s26 = smov %s2470_s29  ;;  %27 = sbr.rel (!%p25_p13) target bundleno = 20 (0x14), region = 144 }
 0x2fb   : > { %s2480_s28 = smov %s2471_s10 }
 0x2fc   : > { %s2481_s29 = smov %s2472_s5 }
 0x2fd   : > { %s2483_s9 = smov %s2474_s17  ;;  %s2484_s10 = smov %s2475_s23 }
 0x301   :  { %1033 = vsyncpa [#allocation3], 1 }
 0x302   :  { %1035 = vsyncpa [#allocation3 + $0x1], 1 }
 0x303   :  { %1036 = vsyncpa [#allocation6], 1 }
 0x304   :  { %1037 = vsyncpa [#allocation4], 1 }
 0x305   :  { %1039 = vsyncpa [#allocation4 + $0x1], 1 }
 0x306   :  { %1040 = vsyncpa [#allocation11], 1 }
 0x307   :  { %1042 = vsyncpa [#allocation11 + $0x1], 1 }

</bundles_post_ra>
